<compile_context>
chip_gen: v6e
topology: v6e:2x2x1
jax: 0.10.0
libtpu: 0.0.40
codegen_flags: <defaults>
</compile_context>

<pallas_src>
import jax
import jax.numpy as jnp
from jax import lax
from jax.experimental import pallas as pl
from jax.experimental.pallas import tpu as pltpu


def embedding_kernel(ids_ref, bpe_ref, pos_ref, out_ref):
    # ids_ref : VMEM (n, 1) int32   -- flattened token ids for this batch block
    # bpe_ref : VMEM (V, H) f32     -- full token-embedding table (resident, 1-buffered)
    # pos_ref : VMEM (S, H) f32     -- only the S positional rows that are used
    # out_ref : VMEM (n, H) f32     -- lane-dense 2-D output slab, n = bt*S
    n = ids_ref.shape[0]
    v = bpe_ref.shape[0]
    s = pos_ref.shape[0]

    ids = ids_ref[...]                                            # (n, 1)

    # One-hot row gather on the MXU: (n, V) @ (V, H) -> (n, H).
    # (Out-of-range ids produce an all-zero row instead of an OOB read.)
    one_hot = (lax.broadcasted_iota(jnp.int32, (n, v), 1) == ids)
    tok = jnp.dot(one_hot.astype(bpe_ref.dtype), bpe_ref[...],
                  preferred_element_type=jnp.float32,
                  precision=lax.Precision.HIGHEST)                # (n, H)

    # Row i of the flattened block has position i % S: tile the small (S, H)
    # pos tile up to (n, H) (cheap; keeps tok un-reshaped and the add 2-D).
    pos = jnp.tile(pos_ref[...], (n // s, 1))                     # (n, H)

    out_ref[...] = (tok + pos).astype(out_ref.dtype)              # one big store


def _default_batch_block(batch, seq_len):
    """Split into 2 parallel grid steps (v7x has 2 TCs) only if each step
    still feeds the MXU >= 256 rows and keeps (8,128) sublane alignment;
    otherwise do everything in one step to amortize per-step overhead."""
    half = batch // 2
    if batch % 2 == 0 and half * seq_len >= 256 and (half * seq_len) % 8 == 0:
        return half
    return batch


def _vmem_limit_bytes(n, vocab, seq_len, hidden, itemsize):
    """Scoped-VMEM request: single-buffered tables + double-buffered ids/out
    + the one-hot / f32 matmul intermediates.  Returns None while the default
    scoped limits (16 MiB v5e / 32 MiB v6e,v7x) comfortably cover it."""
    est = ((vocab + seq_len) * hidden * itemsize       # resident tables (Buffered(1))
           + 2 * n * (4 + hidden * itemsize)           # ids + output, double-buffered
           + n * (vocab + hidden) * 4)                 # one_hot + f32 matmul result
    if est <= 12 * (1 << 20):
        return None
    return min(int(est * 1.5), 48 * (1 << 20))         # stay below v7x's 64 MiB


def embedding_layer(ids, bpe_emb, pos_emb, *, batch_block=None):
    """ids: [B, S] int; bpe_emb: [V, H]; pos_emb: [P, H] -> [B, S, H]."""
    B, S = ids.shape
    V, H = bpe_emb.shape
    P, Hp = pos_emb.shape
    assert Hp == H, "pos/bpe hidden mismatch"
    assert P >= S, "positional-embedding table must have P >= seq_len"

    bt = _default_batch_block(B, S) if batch_block is None else batch_block
    assert B % bt == 0, "batch_block must divide B"
    n = bt * S
    # (8,128) rule: the (n, 1) ids block and (n, H) output block need n % 8 == 0
    # unless the block spans the whole array (bt == B).
    assert n % 8 == 0 or bt == B, "bt*S must be a multiple of 8 (or bt == B)"

    # Wrapper-side layout plumbing (free): flatten ids to a (B*S, 1) column so
    # the kernel sees clean 2-D tiles, and drop the dead (P-S) pos rows before
    # they ever hit VMEM.
    ids_flat = ids.reshape(B * S, 1).astype(jnp.int32)
    pos_used = pos_emb[:S]

    table_mode = pl.Buffered(1)   # constant index_map -> single buffer is enough

    grid_spec = pltpu.PrefetchScalarGridSpec(
        num_scalar_prefetch=0,
        grid=(B // bt,),
        in_specs=[
            pl.BlockSpec((n, 1), lambda b: (b, 0)),                       # ids block
            pl.BlockSpec((V, H), lambda b: (0, 0), pipeline_mode=table_mode),  # bpe table
            pl.BlockSpec((S, H), lambda b: (0, 0), pipeline_mode=table_mode),  # pos rows
        ],
        out_specs=pl.BlockSpec((n, H), lambda b: (b, 0)),
    )

    out_flat = pl.pallas_call(
        embedding_kernel,
        out_shape=jax.ShapeDtypeStruct((B * S, H), bpe_emb.dtype),
        grid_spec=grid_spec,
        compiler_params=pltpu.CompilerParams(
            dimension_semantics=("parallel",),   # disjoint tiles -> 2 TCs on v7x
            vmem_limit_bytes=_vmem_limit_bytes(n, V, S, H, bpe_emb.dtype.itemsize),
        ),
    )(ids_flat, bpe_emb, pos_used)

    return out_flat.reshape(B, S, H)             # wrapper reshape is free


if __name__ == "__main__":
    # Hyperparameters implied by the module's __init__ (small synthetic sizes).
    hyp = {"seq_len": 8, "vocab_num": 64, "pos_vocab_num": 16, "hidden": 128}
    B, S, H = 2, hyp["seq_len"], hyp["hidden"]

    key = jax.random.PRNGKey(0)
    k_bpe, k_pos, k_ids = jax.random.split(key, 3)

    # Deterministic parameter init (nn.Embedding default ~ N(0, 1)).
    bpe_emb = jax.random.normal(k_bpe, (hyp["vocab_num"], H), jnp.float32)
    pos_emb = jax.random.normal(k_pos, (hyp["pos_vocab_num"], H), jnp.float32)

    # Token ids [B, S] (int32 here; torch uses int64 — same semantics).
    x = jax.random.randint(k_ids, (B, S), 0, hyp["vocab_num"], dtype=jnp.int32)

    out = jax.block_until_ready(embedding_layer(x, bpe_emb, pos_emb))

    # Pure-JAX reference of the PyTorch forward.
    ref = bpe_emb[x] + pos_emb[jnp.arange(S)][None, :, :]
    assert out.shape == (B, S, H) and out.dtype == jnp.float32
    assert jnp.allclose(out, ref, atol=1e-5, rtol=1e-5), \
        "kernel output mismatch vs reference"

    print("KERNEL_OK")
</pallas_src>

<mosaic_0001>
module attributes {stable_mosaic.version = 11 : i64} {
  func.func @embedding_kernel(%arg0: i32, %arg1: memref<16x1xi32, #tpu.memory_space<vmem>>, %arg2: memref<64x128xf32, #tpu.memory_space<vmem>>, %arg3: memref<8x128xf32, #tpu.memory_space<vmem>>, %arg4: memref<16x128xf32, #tpu.memory_space<vmem>>) attributes {dimension_semantics = [#tpu.dimension_semantics<parallel>], iteration_bounds = array<i64: 1>, scalar_prefetch = 0 : i64, scratch_operands = 0 : i64, tpu.core_type = #tpu.core_type<tc>, window_params = [{transform_indices = @transform_0, window_bounds = array<i64: 16, 1>}, {pipeline_mode = #tpu.pipeline_mode<synchronous>, transform_indices = @transform_1, window_bounds = array<i64: 64, 128>}, {pipeline_mode = #tpu.pipeline_mode<synchronous>, transform_indices = @transform_2, window_bounds = array<i64: 8, 128>}, {transform_indices = @transform_3, window_bounds = array<i64: 16, 128>}]} {
    %c0 = arith.constant 0 : index
    %c0_0 = arith.constant 0 : index
    %0 = vector.load %arg1[%c0, %c0_0] : memref<16x1xi32, #tpu.memory_space<vmem>>, vector<16x1xi32>
    %1 = tpu.iota {dimensions = array<i32: 1>} : vector<16x64xi32>
    %2 = vector.broadcast %0 : vector<16x1xi32> to vector<16x64xi32>
    %3 = arith.cmpi eq, %1, %2 : vector<16x64xi32>
    %4 = arith.extui %3 : vector<16x64xi1> to vector<16x64xi32>
    %5 = arith.sitofp %4 : vector<16x64xi32> to vector<16x64xf32>
    %c0_1 = arith.constant 0 : index
    %c0_2 = arith.constant 0 : index
    %6 = vector.load %arg2[%c0_1, %c0_2] : memref<64x128xf32, #tpu.memory_space<vmem>>, vector<64x128xf32>
    %cst = arith.constant dense<0.000000e+00> : vector<16x128xf32>
    %7 = tpu.matmul %5, %6, %cst {dimension_numbers = #tpu.dot_dimension_numbers<[1], [0], [0], [1], [0, 0, 1, 1], [], []>, precision = #tpu.contract_precision<fp32>} : vector<16x64xf32>, vector<64x128xf32>, vector<16x128xf32> -> vector<16x128xf32>
    %c0_3 = arith.constant 0 : index
    %c0_4 = arith.constant 0 : index
    %8 = vector.load %arg3[%c0_3, %c0_4] : memref<8x128xf32, #tpu.memory_space<vmem>>, vector<8x128xf32>
    %9 = tpu.concatenate %8, %8 in 0 : vector<8x128xf32>, vector<8x128xf32> -> vector<16x128xf32>
    %10 = arith.addf %7, %9 : vector<16x128xf32>
    %c0_5 = arith.constant 0 : index
    %c0_6 = arith.constant 0 : index
    %11 = vector.load %arg4[%c0_5, %c0_6] : memref<16x128xf32, #tpu.memory_space<vmem>>, vector<16x128xf32>
    tpu.vector_store %arg4[%c0_5, %c0_6], %10 {strides = array<i32>} : memref<16x128xf32, #tpu.memory_space<vmem>>, vector<16x128xf32>,
    return
  }
  func.func @transform_0(%arg0: i32) -> (i32, i32) {
    %c0_i32 = arith.constant 0 : i32
    %c0_i32_0 = arith.constant 0 : i32
    return %arg0, %c0_i32 : i32, i32
  }
  func.func @transform_1(%arg0: i32) -> (i32, i32) {
    %c0_i32 = arith.constant 0 : i32
    %c0_i32_0 = arith.constant 0 : i32
    %c0_i32_1 = arith.constant 0 : i32
    return %c0_i32, %c0_i32_0 : i32, i32
  }
  func.func @transform_2(%arg0: i32) -> (i32, i32) {
    %c0_i32 = arith.constant 0 : i32
    %c0_i32_0 = arith.constant 0 : i32
    %c0_i32_1 = arith.constant 0 : i32
    return %c0_i32, %c0_i32_0 : i32, i32
  }
  func.func @transform_3(%arg0: i32) -> (i32, i32) {
    %c0_i32 = arith.constant 0 : i32
    %c0_i32_0 = arith.constant 0 : i32
    return %arg0, %c0_i32 : i32, i32
  }
}

</mosaic_0001>

<bundles_post_ra>
// kernel: tpu_custom_call.1
= control target key start
LH: loop header
LB: loop body
LE: loop exit
PB: predicated region body
PF: predicated region fallthrough
CT: control target
= control target key end

     0   :  { %8 = vsyncpa [#allocation3], 0  ;;  %s1120_s0 = inlined_call_operand.vmem [shape: s32[16,1], index: 0, kind: input, shape index: {}]   ;;  %s1121_s1 = inlined_call_operand.hbm [shape: f32[64,128], index: 1, kind: input, shape index: {}]   ;;  %s1122_s2 = inlined_call_operand.vmem [shape: f32[8,128], index: 2, kind: input, shape index: {}]   ;;  %s1123_s3 = inlined_call_operand.hbm [shape: f32[16,128], index: 3, kind: output, shape index: {}]  }
   0x1   :  { %9 = vsyncpa [#allocation4], 0  ;;  %s893_s12 = smov [#allocation2]  }
   0x2   :  { %s17_s13 = sshll.u32 %s893_s12, 4  ;;  %s18_s13 = int_to_ptr.vmem [resolvable:$true] %s17_s13 }
   0x3   :  { %s857_s14 = scalar_lea.vmem %s18_s13, 1024  ;;  %p862_p1 = scmp.lt.s32.totalorder %s18_s13, %s18_s13 }
   0x4   :  { %p858_p0 = scmp.ne.s32.totalorder %s18_s13, %s857_s14  ;;  %p863_p2 = scmp.lt.s32.totalorder %s857_s14, %s857_s14 }
   0x6   :  { %p864_p3 = por %p863_p2, %p862_p1 }
   0x8   :  { %p865_p4 = pnand %p864_p3, %p858_p0 }
   0xa   :  { %868 = shalt.err (!%p865_p4)
}
   0xb   :  { %s894_s15 = smov 128   ;;  %s895_s16 = smov 8  }
   0xc   :  { %23 = dma.hbm_to_vmem [thread:$0]  %s1121_s1, 1024, %s18_s13, [#allocation3], %s894_s15, %s894_s15, %s895_s16  }
   0xd   :  { %889 = dma.done.wait [#allocation3], 1024  }
   0xe   :  { %890 = vsyncadd [#allocation3], 4294966272  ;;  %v896_v0 = vmov 0   ;;  %v29_v1 = vld [vmem:[%s1120_s0] sm:$0xff]  ;;  %v30_v2 = vld [vmem:[%s1120_s0 + $0x8] sm:$0xff]  ;;  %v31_v51 = vlaneseq  ;;  %vm54_vm0 = vcmask 523264  }
   0xf   :  { %848 = vset.pattern.permute.xlu0 %v896_v0  ;;  %v52_v3 = vld [vmem:[#allocation2 + $0x38] sm:$0xff]  ;;  %v51_v5 = vld [vmem:[#allocation2 + $0x30] sm:$0xff]  ;;  %v50_v6 = vld [vmem:[#allocation2 + $0x28] sm:$0xff]  ;;  %v897_v54 = vmov 0.0  }
  0x10   :  { %34 = vperm.xlu0 %848, %v29_v1   ;;  %v931_v4 = vand.u32 4294901760, %v52_v3  ;;  %v49_v7 = vld [vmem:[#allocation2 + $0x20] sm:$0xff]  ;;  %v933_v8 = vand.u32 4294901760, %v51_v5  ;;  %v935_v9 = vand.u32 4294901760, %v50_v6  ;;  %v48_v11 = vld [vmem:[#allocation2 + $0x18] sm:$0xff]  ;;  %v47_v12 = vld [vmem:[#allocation2 + $0x10] sm:$0xff] }
  0x11   :  { %v937_v10 = vand.u32 4294901760, %v49_v7  ;;  %v46_v13 = vld [vmem:[#allocation2 + $0x8] sm:$0xff]  ;;  %v942_v15 = vand.u32 4294901760, %v48_v11  ;;  %v945_v16 = vand.u32 4294901760, %v47_v12  ;;  %v45_v18 = vld [vmem:[#allocation2] sm:$0xff]  ;;  %v32_v52 = vand.u32 127, %v31_v51 }
  0x12   :  { %v940_v14 = vsub.f32 %v52_v3, %v931_v4  ;;  %728 = vmatprep.subr.mxu0 %v931_v4  ;;  %v947_v17 = vand.u32 4294901760, %v46_v13  ;;  %v950_v19 = vsub.f32 %v51_v5, %v933_v8  ;;  %v953_v20 = vsub.f32 %v50_v6, %v935_v9  ;;  %v53_v5 = vld [vmem:[%s1122_s2] sm:$0xff]  ;;  %s898_s2 = smov [#allocation5]  }
  0x13   :  { %v956_v21 = vsub.f32 %v49_v7, %v937_v10  ;;  %729 = vmatpush3.msra.mxu0 %v931_v4  ;;  %v963_v23 = vsub.f32 %v48_v11, %v942_v15  ;;  %v966_v24 = vsub.f32 %v47_v12, %v945_v16  ;;  %v969_v25 = vand.u32 4294901760, %v45_v18  ;;  %s648_s23 = sshll.u32 %s898_s2, 4  ;;  %s649_s23 = int_to_ptr.vmem [resolvable:$true] %s648_s23 }
  0x14   :  { %37 = vperm.xlu0 %848, %v30_v2   ;;  %v960_v22 = vand.u32 4294901760, %v940_v14  ;;  %730 = vmatprep.subr.mxu0 %v933_v8  ;;  %v972_v26 = vand.u32 4294901760, %v950_v19  ;;  %v975_v27 = vand.u32 4294901760, %v953_v20  ;;  %v987_v31 = vsub.f32 %v46_v13, %v947_v17  ;;  %s869_s24 = scalar_lea.vmem %s649_s23, 256  ;;  %p874_p6 = scmp.lt.s32.totalorder %s649_s23, %s649_s23 }
  0x15   :  { %v978_v28 = vand.u32 4294901760, %v956_v21  ;;  %731 = vmatpush3.msra.mxu0 %v933_v8  ;;  %v984_v30 = vand.u32 4294901760, %v963_v23  ;;  %v998_v36 = vand.u32 4294901760, %v966_v24  ;;  %v1001_v37 = vsub.f32 %v45_v18, %v969_v25  ;;  %p870_p5 = scmp.ne.s32.totalorder %s649_s23, %s869_s24  ;;  %p875_p7 = scmp.lt.s32.totalorder %s869_s24, %s869_s24 }
  0x16   :  { %v174_v29 = vsub.f32 %v940_v14, %v960_v22  ;;  %732 = vmatprep.subr.mxu0 %v935_v9  ;;  %v181_v32 = vsub.f32 %v950_v19, %v972_v26  ;;  %v188_v33 = vsub.f32 %v953_v20, %v975_v27  ;;  %v1008_v41 = vand.u32 4294901760, %v987_v31 }
  0x17   :  { %733 = vmatpush3.msra.mxu0 %v935_v9  ;;  %v195_v35 = vsub.f32 %v956_v21, %v978_v28  ;;  %v202_v40 = vsub.f32 %v963_v23, %v984_v30  ;;  %v209_v43 = vsub.f32 %v966_v24, %v998_v36  ;;  %v1015_v44 = vand.u32 4294901760, %v1001_v37  ;;  %p876_p8 = por %p875_p7, %p874_p6 }
  0x18   :  { %v175_v34 = vand.u32 4294901760, %v174_v29  ;;  %734 = vmatprep.subr.mxu0 %v937_v10  ;;  %v182_v38 = vand.u32 4294901760, %v181_v32  ;;  %v189_v39 = vand.u32 4294901760, %v188_v33  ;;  %v216_v46 = vsub.f32 %v987_v31, %v1008_v41 }
  0x19   :  { %735 = vmatpush3.msra.mxu0 %v937_v10  ;;  %v196_v42 = vand.u32 4294901760, %v195_v35  ;;  %v203_v45 = vand.u32 4294901760, %v202_v40  ;;  %v210_v47 = vand.u32 4294901760, %v209_v43  ;;  %v223_v48 = vsub.f32 %v1001_v37, %v1015_v44  ;;  %p877_p9 = pnand %p876_p8, %p870_p5 }
  0x1a   :  { %747 = vmatprep.subr.mxu1 %v175_v34  ;;  %736 = vmatprep.subr.mxu0 %v942_v15  ;;  %v217_v49 = vand.u32 4294901760, %v216_v46 }
  0x1b   :  { %748 = vmatpush3.msra.mxu1 %v175_v34  ;;  %737 = vmatpush3.msra.mxu0 %v942_v15  ;;  %v224_v50 = vand.u32 4294901760, %v223_v48 }
  0x1c   :  { %749 = vmatprep.subr.mxu1 %v182_v38  ;;  %738 = vmatprep.subr.mxu0 %v945_v16 }
  0x1d   :  { %750 = vmatpush3.msra.mxu1 %v182_v38  ;;  %739 = vmatpush3.msra.mxu0 %v945_v16 }
  0x1e   :  { %751 = vmatprep.subr.mxu1 %v189_v39  ;;  %740 = vmatprep.subr.mxu0 %v947_v17 }
  0x1f   :  { %752 = vmatpush3.msra.mxu1 %v189_v39  ;;  %741 = vmatpush3.msra.mxu0 %v947_v17 }
  0x20   :  { %753 = vmatprep.subr.mxu1 %v196_v42  ;;  %742 = vmatprep.subr.mxu0 %v969_v25 }
  0x21   :  { %754 = vmatpush3.msra.mxu1 %v196_v42  ;;  %743 = vmatpush3.msra.mxu0 %v969_v25 }
  0x22   :  { %755 = vmatprep.subr.mxu1 %v203_v45  ;;  %766 = vmatprep.subr.mxu0 %v940_v14 }
  0x23   :  { %756 = vmatpush3.msra.mxu1 %v203_v45 }
  0x24   :  { %757 = vmatprep.subr.mxu1 %v210_v47 }
  0x25   :  { %758 = vmatpush3.msra.mxu1 %v210_v47 }
  0x26   :  { %759 = vmatprep.subr.mxu1 %v217_v49 }
  0x27   :  { %760 = vmatpush3.msra.mxu1 %v217_v49 }
  0x28   :  { %761 = vmatprep.subr.mxu1 %v224_v50 }
  0x29   :  { %762 = vmatpush3.msra.mxu1 %v224_v50 }
  0x2a   :  { %785 = vmatprep.subr.mxu1 %v931_v4 }
  0x8b   :  { %v35_v53 = vpop.permute.xlu0 %34 }
  0x8c   :  { %vm39_vm1 = vcmp.eq.s32.totalorder %v32_v52, %v35_v53 }
  0x8d   :  { %v1029_v55 = vsel %vm39_vm1, 1.0, %v897_v54 }
  0x8e   :  { %v56_v56 = vsel %vm54_vm0, %v1029_v55, 0  ;;  %763 = vmatprep.mubr.msk.f32.mxu1 %vm54_vm0, %v1029_v55 }
  0x8f   :  { %v135_v57 = vsub.f32 %v56_v56, %v56_v56  ;;  %v38_v58 = vpop.permute.xlu0 %37 }
  0x90   :  { %vm40_vm2 = vcmp.eq.s32.totalorder %v32_v52, %v38_v58 }
  0x91   :  { %v1035_v59 = vsel %vm40_vm2, 1.0, %v897_v54  ;;  %v136_v60 = vand.u32 4294901760, %v135_v57 }
  0x92   :  { %v59_v61 = vsel %vm54_vm0, %v1035_v59, 0  ;;  %764 = vmatmul.mubr.msk.f32.vlgmr.msra.gmra.mxu1 %vm54_vm0, %v1035_v59 }
  0x93   :  { %v145_v62 = vsub.f32 %v59_v61, %v59_v61  ;;  %786 = vmatpush3.msra.mxu1 %v931_v4  ;;  %801 = vmatprep.mubr.f32.mxu1 %v136_v60  ;;  %v137_v63 = vsub.f32 %v135_v57, %v136_v60 }
  0x94   :  { %787 = vmatprep.subr.mxu1 %v933_v8 }
  0x95   :  { %788 = vmatpush3.msra.mxu1 %v933_v8  ;;  %v138_v0 = vand.u32 4294901760, %v137_v63  ;;  %v146_v1 = vand.u32 4294901760, %v145_v62 }
  0x96   :  { %789 = vmatprep.subr.mxu1 %v935_v9 }
  0x97   :  { %790 = vmatpush3.msra.mxu1 %v935_v9  ;;  %744 = vmatprep.mubr.f32.mxu0 %v138_v0  ;;  %v147_v2 = vsub.f32 %v145_v62, %v146_v1 }
  0x98   :  { %791 = vmatprep.subr.mxu1 %v937_v10 }
  0x99   :  { %792 = vmatpush3.msra.mxu1 %v937_v10  ;;  %v148_v3 = vand.u32 4294901760, %v147_v2 }
  0x9a   :  { %793 = vmatprep.subr.mxu1 %v942_v15 }
  0x9b   :  { %794 = vmatpush3.msra.mxu1 %v942_v15  ;;  %745 = vmatmul.mubr.f32.vlgmr.msra.gmra.mxu0 %v148_v3 }
  0x9c   :  { %767 = vmatpush3.msra.mxu0 %v940_v14  ;;  %795 = vmatprep.subr.mxu1 %v945_v16 }
  0x9d   :  { %768 = vmatprep.subr.mxu0 %v950_v19  ;;  %782 = vmatprep.mubr.f32.mxu0 %v135_v57 }
  0x9e   :  { %796 = vmatpush3.msra.mxu1 %v945_v16  ;;  %769 = vmatpush3.msra.mxu0 %v950_v19 }
  0x9f   :  { %797 = vmatprep.subr.mxu1 %v947_v17  ;;  %770 = vmatprep.subr.mxu0 %v953_v20 }
  0xa0   :  { %798 = vmatpush3.msra.mxu1 %v947_v17  ;;  %771 = vmatpush3.msra.mxu0 %v953_v20 }
  0xa1   :  { %799 = vmatprep.subr.mxu1 %v969_v25  ;;  %772 = vmatprep.subr.mxu0 %v956_v21 }
  0xa2   :  { %800 = vmatpush3.msra.mxu1 %v969_v25  ;;  %773 = vmatpush3.msra.mxu0 %v956_v21 }
  0xa3   :  { %802 = vmatmul.mubr.f32.vlgmr.msra.gmra.mxu1 %v146_v1  ;;  %823 = vmatprep.subr.mxu1 %v931_v4 }
  0xa4   :  { %774 = vmatprep.subr.mxu0 %v963_v23  ;;  %824 = vmatpush3.msra.mxu1 %v931_v4 }
  0xa5   :  { %839 = vmatprep.mubr.msk.f32.mxu1 %vm54_vm0, %v1029_v55  ;;  %775 = vmatpush3.msra.mxu0 %v963_v23 }
  0xa6   :  { %825 = vmatprep.subr.mxu1 %v933_v8  ;;  %776 = vmatprep.subr.mxu0 %v966_v24 }
  0xa7   :  { %826 = vmatpush3.msra.mxu1 %v933_v8  ;;  %777 = vmatpush3.msra.mxu0 %v966_v24 }
  0xa8   :  { %827 = vmatprep.subr.mxu1 %v935_v9  ;;  %778 = vmatprep.subr.mxu0 %v987_v31 }
  0xa9   :  { %828 = vmatpush3.msra.mxu1 %v935_v9  ;;  %779 = vmatpush3.msra.mxu0 %v987_v31 }
  0xaa   :  { %829 = vmatprep.subr.mxu1 %v937_v10  ;;  %780 = vmatprep.subr.mxu0 %v1001_v37 }
  0xab   :  { %830 = vmatpush3.msra.mxu1 %v937_v10  ;;  %781 = vmatpush3.msra.mxu0 %v1001_v37 }
  0xac   :  { %831 = vmatprep.subr.mxu1 %v942_v15  ;;  %783 = vmatmul.mubr.f32.vlgmr.msra.gmra.mxu0 %v145_v62 }
  0xad   :  { %804 = vmatprep.subr.mxu0 %v960_v22  ;;  %832 = vmatpush3.msra.mxu1 %v942_v15 }
  0xae   :  { %805 = vmatpush3.msra.mxu0 %v960_v22  ;;  %820 = vmatprep.mubr.msk.f32.mxu0 %vm54_vm0, %v1029_v55 }
  0xaf   :  { %833 = vmatprep.subr.mxu1 %v945_v16  ;;  %806 = vmatprep.subr.mxu0 %v972_v26 }
  0xb0   :  { %834 = vmatpush3.msra.mxu1 %v945_v16  ;;  %807 = vmatpush3.msra.mxu0 %v972_v26 }
  0xb1   :  { %835 = vmatprep.subr.mxu1 %v947_v17  ;;  %808 = vmatprep.subr.mxu0 %v975_v27 }
  0xb2   :  { %836 = vmatpush3.msra.mxu1 %v947_v17  ;;  %809 = vmatpush3.msra.mxu0 %v975_v27 }
  0xb3   :  { %837 = vmatprep.subr.mxu1 %v969_v25  ;;  %810 = vmatprep.subr.mxu0 %v978_v28 }
  0xb4   :  { %838 = vmatpush3.msra.mxu1 %v969_v25  ;;  %811 = vmatpush3.msra.mxu0 %v978_v28 }
  0xb5   :  { %840 = vmatmul.mubr.msk.f32.vlgmr.msra.gmra.mxu1 %vm54_vm0, %v1035_v59  ;;  %812 = vmatprep.subr.mxu0 %v984_v30 }
  0xb6   :  { %813 = vmatpush3.msra.mxu0 %v984_v30 }
  0xb7   :  { %814 = vmatprep.subr.mxu0 %v998_v36 }
  0xb8   :  { %815 = vmatpush3.msra.mxu0 %v998_v36 }
  0xb9   :  { %816 = vmatprep.subr.mxu0 %v1008_v41 }
  0xba   :  { %817 = vmatpush3.msra.mxu0 %v1008_v41 }
  0xbb   :  { %818 = vmatprep.subr.mxu0 %v1015_v44 }
  0xbc   :  { %819 = vmatpush3.msra.mxu0 %v1015_v44 }
  0xbd   :  { %821 = vmatmul.mubr.msk.f32.vlgmr.msra.gmra.mxu0 %vm54_vm0, %v1035_v59 }
 0x152   :  { %v765_v6 = vpop.f32.mrf.mxu1 }
 0x154   :  { %v261_v11 = vpop.f32.mrf.mxu1 }
 0x15b   :  { %v746_v4 = vpop.f32.mrf.mxu0 }
 0x15c   :  { %v151_v8 = vadd.f32 %v746_v4, %v53_v5 }
 0x15d   :  { %v140_v7 = vpop.f32.mrf.mxu0 }
 0x15e   :  { %v141_v10 = vadd.f32 %v140_v7, %v53_v5  ;;  %v268_v12 = vadd.f32 %v765_v6, %v151_v8 }
 0x160   :  { %v262_v16 = vadd.f32 %v261_v11, %v141_v10 }
 0x163   :  { %v803_v13 = vpop.f32.mrf.mxu1 }
 0x165   :  { %v443_v18 = vpop.f32.mrf.mxu1 }
 0x16c   :  { %v784_v9 = vpop.f32.mrf.mxu0 }
 0x16d   :  { %v363_v15 = vadd.f32 %v784_v9, %v268_v12 }
 0x16e   :  { %v355_v14 = vpop.f32.mrf.mxu0 }
 0x16f   :  { %v356_v17 = vadd.f32 %v355_v14, %v262_v16  ;;  %v452_v19 = vadd.f32 %v803_v13, %v363_v15 }
 0x171   :  { %v444_v23 = vadd.f32 %v443_v18, %v356_v17 }
 0x175   :  { %v841_v20 = vpop.f32.mrf.mxu1 }
 0x177   :  { %v631_v27 = vpop.f32.mrf.mxu1 }
 0x17d   :  { %v822_v21 = vpop.f32.mrf.mxu0 }
 0x17e   :  { %v553_v22 = vadd.f32 %v822_v21, %v452_v19 }
 0x17f   :  { %v546_v24 = vpop.f32.mrf.mxu0 }
 0x180   :  { %v638_v25 = vadd.f32 %v841_v20, %v553_v22  ;;  %v547_v26 = vadd.f32 %v546_v24, %v444_v23 }
 0x182   :  { %642 = vst [vmem:[#allocation5 + $0x8] sm:$0xff] %v638_v25  ;;  %v632_v28 = vadd.f32 %v631_v27, %v547_v26 }
 0x184   :  { %641 = vst [vmem:[#allocation5] sm:$0xff] %v632_v28 }
 0x185   :  { %880 = shalt.err (!%p877_p9)
}
 0x186   :  { %654 = dma.vmem_to_hbm [thread:$0]  %s649_s23, 256, %s1123_s3, [#allocation4], %s894_s15, %s894_s15, %s895_s16  }
 0x187   :  { %891 = dma.done.wait [#allocation4], 256  }
 0x188   :  { %892 = vsyncadd [#allocation4], 4294967040 }
 0x189   :  { %658 = vsyncpa [#allocation3], 1 }
 0x18a   :  { %659 = vsyncpa [#allocation4], 1 }

</bundles_post_ra>
